<compile_context>
chip_gen: v5e
topology: v5e:2x2
jax: 0.10.0
libtpu: 0.0.40
codegen_flags: <defaults>
</compile_context>

<pallas_src>
import functools

import jax
import jax.numpy as jnp
from jax.experimental import pallas as pl
from jax.experimental.pallas import tpu as pltpu


def make_positional_encoding(max_seq_len: int, d_model: int) -> jnp.ndarray:
    """Vectorized version of the double python loop in __init__.

    Returns (max_seq_len, 1, d_model // 2) float32.
    """
    half = d_model // 2
    quarter = d_model // 4
    pos = jnp.arange(max_seq_len, dtype=jnp.float32)[:, None]          # (L, 1)
    i = jnp.arange(quarter, dtype=jnp.float32)[None, :]                # (1, q)
    bot = jnp.power(jnp.float32(10000.0), 2.0 * i / float(d_model))    # (1, q)
    ang = pos / bot                                                    # (L, q)
    pe = jnp.zeros((max_seq_len, half), dtype=jnp.float32)
    pe = pe.at[:, 0::2].set(jnp.sin(ang))
    pe = pe.at[:, 1::2].set(jnp.cos(ang))
    return pe[:, None, :]                                              # (L, 1, half)


def _encode_kernel(pe_ref, x_ref, o_ref, *, h):
    # Eval mode: two direct slice-stores into disjoint lane ranges (no concat).
    o_ref[:, :h] = pe_ref[...].astype(o_ref.dtype)
    o_ref[:, h:] = x_ref[...].astype(o_ref.dtype)


def _encode_dropout_kernel(pe_ref, x_ref, rnd_ref, o_ref, *, h, threshold, inv_keep):
    # Inverted dropout: keep iff 23-bit uniform int < threshold (= keep_prob * 2^23).
    keep_pe = rnd_ref[:, :h] < threshold
    keep_x = rnd_ref[:, h:] < threshold
    o_ref[:, :h] = jnp.where(keep_pe, pe_ref[...] * inv_keep, 0.0).astype(o_ref.dtype)
    o_ref[:, h:] = jnp.where(keep_x, x_ref[...] * inv_keep, 0.0).astype(o_ref.dtype)


def sincos_concat_pos_encode(x, pe_table, *, p=0.1, seed=0, training=True):
    """x: (seq_len, batch, emb). pe_table: (max_seq_len, 1, d_model//2)."""
    S, B, E = x.shape
    max_len, _, H = pe_table.shape
    assert S <= max_len, f"seq_len {S} exceeds max_seq_len {max_len}"
    W = H + E
    R = S * B
    dtype = x.dtype
    apply_dropout = bool(training) and float(p) > 0.0

    # Lane/sublane-dense 2-D row views: rows = seq*batch, features on lanes.
    pe_rows = jnp.broadcast_to(pe_table[:S].astype(dtype), (S, B, H)).reshape(R, H)
    x_rows = x.reshape(R, E)

    itemsize = jnp.dtype(dtype).itemsize

    def _step_vmem_bytes(tr):
        b = tr * (H + E + W) * itemsize          # pe + x + out tiles
        if apply_dropout:
            b += tr * W * 4                      # int32 random tile
        return 2 * b                             # double-buffered pipeline

    # ~512-row tiles get close to the HBM roofline; shrink if the pipelined
    # working set would crowd v7x's smaller scoped VMEM.
    TR = R if R <= 512 else 512
    while TR > 8 and _step_vmem_bytes(TR) > 24 * 1024 * 1024:
        TR = max(8, (TR // 2) // 8 * 8)
    if TR != R and TR % 8 != 0:
        TR = max(8, (TR // 8) * 8)
    grid = (pl.cdiv(R, TR),)

    in_specs = [
        pl.BlockSpec((TR, H), lambda i: (i, 0)),     # PE rows
        pl.BlockSpec((TR, E), lambda i: (i, 0)),     # x rows
    ]
    args = [pe_rows, x_rows]

    if apply_dropout:
        keep_prob = 1.0 - float(p)
        threshold = min(int(round(keep_prob * float(1 << 23))), 1 << 23)
        # 23-bit uniform integers, one per output element; each grid tile gets
        # its own slice, so no shared-mask-across-tiles trap.
        rnd = (jax.random.bits(jax.random.PRNGKey(seed), (R, W), dtype=jnp.uint32)
               >> 9).astype(jnp.int32)
        in_specs.append(pl.BlockSpec((TR, W), lambda i: (i, 0)))
        args.append(rnd)
        kernel = functools.partial(_encode_dropout_kernel, h=H,
                                   threshold=threshold, inv_keep=1.0 / keep_prob)
    else:
        kernel = functools.partial(_encode_kernel, h=H)

    out_rows = pl.pallas_call(
        kernel,
        out_shape=jax.ShapeDtypeStruct((R, W), dtype),
        grid=grid,
        in_specs=in_specs,
        out_specs=pl.BlockSpec((TR, W), lambda i: (i, 0)),
        compiler_params=pltpu.CompilerParams(dimension_semantics=("parallel",)),
    )(*args)
    return out_rows.reshape(S, B, W)


if __name__ == "__main__":
    d_model = 32          # -> positional-encoding feature dim = 16
    max_seq_len = 64
    seq_len, batch, emb = 8, 2, d_model
    half = d_model // 2

    key = jax.random.PRNGKey(0)
    x = jax.random.normal(key, (seq_len, batch, emb), dtype=jnp.float32)
    pe_table = make_positional_encoding(max_seq_len, d_model)

    # 1) Eval path (dropout == identity): exact match vs pure-JAX reference.
    out_eval = jax.block_until_ready(
        sincos_concat_pos_encode(x, pe_table, p=0.1, training=False))
    ref = jnp.concatenate(
        [jnp.broadcast_to(pe_table[:seq_len], (seq_len, batch, half)), x], axis=-1)
    assert out_eval.shape == (seq_len, batch, half + emb)
    assert jnp.allclose(out_eval, ref, atol=1e-6), "eval-mode mismatch vs reference"

    # 2) Training path (inverted dropout in-kernel via integer threshold compare).
    keep_prob = 0.9
    out_train = jax.block_until_ready(
        sincos_concat_pos_encode(x, pe_table, p=0.1, seed=1234, training=True))
    assert out_train.shape == (seq_len, batch, half + emb)
    # Every surviving element equals the undropped value scaled by 1/keep_prob.
    mask = out_train != 0
    assert jnp.allclose(jnp.where(mask, out_train, 0.0),
                        jnp.where(mask, ref / keep_prob, 0.0),
                        atol=1e-5), "training-mode dropout scaling mismatch"

    print("KERNEL_OK")
</pallas_src>

<mosaic_0001>
module attributes {stable_mosaic.version = 11 : i64} {
  func.func @_encode_kernel(%arg0: i32, %arg1: memref<16x16xf32, #tpu.memory_space<vmem>>, %arg2: memref<16x32xf32, #tpu.memory_space<vmem>>, %arg3: memref<16x48xf32, #tpu.memory_space<vmem>>) attributes {dimension_semantics = [#tpu.dimension_semantics<parallel>], iteration_bounds = array<i64: 1>, scalar_prefetch = 0 : i64, scratch_operands = 0 : i64, tpu.core_type = #tpu.core_type<tc>, window_params = [{transform_indices = @transform_0, window_bounds = array<i64: 16, 16>}, {transform_indices = @transform_1, window_bounds = array<i64: 16, 32>}, {transform_indices = @transform_2, window_bounds = array<i64: 16, 48>}]} {
    %c0 = arith.constant 0 : index
    %c0_0 = arith.constant 0 : index
    %0 = vector.load %arg1[%c0, %c0_0] : memref<16x16xf32, #tpu.memory_space<vmem>>, vector<16x16xf32>
    %c0_1 = arith.constant 0 : index
    %c0_2 = arith.constant 0 : index
    %1 = vector.load %arg3[%c0_1, %c0_2] : memref<16x48xf32, #tpu.memory_space<vmem>>, vector<16x16xf32>
    tpu.vector_store %arg3[%c0_1, %c0_2], %0 {strides = array<i32>} : memref<16x48xf32, #tpu.memory_space<vmem>>, vector<16x16xf32>,
    %c0_3 = arith.constant 0 : index
    %c0_4 = arith.constant 0 : index
    %2 = vector.load %arg2[%c0_3, %c0_4] : memref<16x32xf32, #tpu.memory_space<vmem>>, vector<16x32xf32>
    %c0_5 = arith.constant 0 : index
    %c16 = arith.constant 16 : index
    %3 = vector.load %arg3[%c0_5, %c16] : memref<16x48xf32, #tpu.memory_space<vmem>>, vector<16x32xf32>
    tpu.vector_store %arg3[%c0_5, %c16], %2 {strides = array<i32>} : memref<16x48xf32, #tpu.memory_space<vmem>>, vector<16x32xf32>,
    return
  }
  func.func @transform_0(%arg0: i32) -> (i32, i32) {
    %c0_i32 = arith.constant 0 : i32
    %c0_i32_0 = arith.constant 0 : i32
    return %arg0, %c0_i32 : i32, i32
  }
  func.func @transform_1(%arg0: i32) -> (i32, i32) {
    %c0_i32 = arith.constant 0 : i32
    %c0_i32_0 = arith.constant 0 : i32
    return %arg0, %c0_i32 : i32, i32
  }
  func.func @transform_2(%arg0: i32) -> (i32, i32) {
    %c0_i32 = arith.constant 0 : i32
    %c0_i32_0 = arith.constant 0 : i32
    return %arg0, %c0_i32 : i32, i32
  }
}

</mosaic_0001>

<bundles_post_ra>
// kernel: tpu_custom_call.1
= control target key start
LH: loop header
LB: loop body
LE: loop exit
PB: predicated region body
PF: predicated region fallthrough
CT: control target
= control target key end

     0   :  { %7 = vsyncpa [#allocation3], 0  ;;  %s205_s0 = inlined_call_operand.hbm [shape: f32[16,16], index: 0, kind: input, shape index: {}]   ;;  %s206_s1 = inlined_call_operand.hbm [shape: f32[16,32], index: 1, kind: input, shape index: {}]   ;;  %s207_s2 = inlined_call_operand.hbm [shape: f32[16,48], index: 2, kind: output, shape index: {}]  }
   0x1   :  { %8 = vsyncpa [#allocation6], 0 }
   0x2   :  { %9 = vsyncpa [#allocation4], 0  ;;  %s14_s11 = sshll.u32 %s205_s0, 4  ;;  %s166_s12 = smov [#allocation2]   ;;  %s15_s11 = int_to_ptr.hbm [resolvable:$true] %s14_s11 }
   0x3   :  { %s16_s13 = sshll.u32 %s166_s12, 4  ;;  %s27_s16 = sshll.u32 %s206_s1, 4  ;;  %s17_s13 = int_to_ptr.vmem [resolvable:$true] %s16_s13  ;;  %s28_s16 = int_to_ptr.hbm [resolvable:$true] %s27_s16 }
   0x4   :  { %s167_s17 = smov 128   ;;  %s168_s18 = smov 8  }
   0x5   :  { %22 = dma.hbm_to_vmem [thread:$0]  %s15_s11, 256, %s17_s13, [#allocation3], %s167_s17, %s167_s17, %s168_s18  }
   0x6   :  { %s169_s19 = smov [#allocation5]  }
   0x7   :  { %s29_s20 = sshll.u32 %s169_s19, 4  ;;  %s30_s20 = int_to_ptr.vmem [resolvable:$true] %s29_s20 }
   0x8   :  { %35 = dma.hbm_to_vmem [thread:$0]  %s28_s16, 256, %s30_s20, [#allocation6], %s167_s17, %s167_s17, %s168_s18  }
   0x9   :  { %160 = dma.done.wait [#allocation3], 256  }
   0xa   :  { %161 = vsyncadd [#allocation3], 4294967040 }
   0xb   :  { %162 = dma.done.wait [#allocation6], 256  }
   0xc   :  { %163 = vsyncadd [#allocation6], 4294967040  ;;  %v49_v0 = vld [vmem:[#allocation5] sm:$0xff]  ;;  %s170_s0 = smov 16   ;;  %v50_v1 = vld [vmem:[#allocation5 + $0x8] sm:$0xff]  ;;  %vm46_vm0 = vcmask 130048  }
   0xd   :  { %53 = vrot.lane.b32.xlu0 %v49_v0, %s170_s0  ;;  %v44_v2 = vld [vmem:[#allocation2] sm:$0xff]  ;;  %v45_v3 = vld [vmem:[#allocation2 + $0x8] sm:$0xff]  ;;  %vm59_vm1 = vcmask 392320   ;;  %s171_s1 = smov [#allocation7]   ;;  %s68_s24 = sshll.u32 %s207_s2, 4  ;;  %s69_s24 = int_to_ptr.hbm [resolvable:$true] %s68_s24 }
   0xe   :  { %47 = vst.msk [vmem:[#allocation7] sm:$0xff] %vm46_vm0, %v44_v2  ;;  %s66_s21 = sshll.u32 %s171_s1, 4  ;;  %s67_s21 = int_to_ptr.vmem [resolvable:$true] %s66_s21 }
   0xf   :  { %48 = vst.msk [vmem:[#allocation7 + $0x8] sm:$0xff] %vm46_vm0, %v45_v3 }
  0x15   :  { %55 = vrot.lane.b32.xlu0 %v50_v1, %s170_s0 }
  0x7f   :  { %v54_v4 = vpop.permute.xlu0 %53 }
  0x80   :  { %60 = vst.msk [vmem:[#allocation7] sm:$0xff] %vm59_vm1, %v54_v4 }
  0x87   :  { %v56_v5 = vpop.permute.xlu0 %55 }
  0x88   :  { %61 = vst.msk [vmem:[#allocation7 + $0x8] sm:$0xff] %vm59_vm1, %v56_v5 }
  0x89   :  { %74 = dma.vmem_to_hbm [thread:$0]  %s67_s21, 256, %s69_s24, [#allocation4], %s167_s17, %s167_s17, %s168_s18  }
  0x8a   :  { %164 = dma.done.wait [#allocation4], 256  }
  0x8b   :  { %165 = vsyncadd [#allocation4], 4294967040 }
  0x8c   :  { %79 = vsyncpa [#allocation3], 1 }
  0x8d   :  { %80 = vsyncpa [#allocation6], 1 }
  0x8e   :  { %81 = vsyncpa [#allocation4], 1 }

</bundles_post_ra>
